<compile_context>
chip_gen: v7x
topology: tpu7x:2x2x1
jax: 0.10.0
libtpu: 0.0.40
codegen_flags: <defaults>
</compile_context>

<pallas_src>
import jax
import jax.numpy as jnp
from jax import lax
from jax.experimental import pallas as pl
from jax.experimental.pallas import tpu as pltpu


def _round_up(x, m):
    return ((x + m - 1) // m) * m


def mlp_ag_kernel(x_ref, w_ref, b_ref, o_ref):
    # x_ref: (tm, n_mlp)   input rows        (lanes = features)
    # w_ref: (2, n_mlp)    Linear weight, PyTorch layout (VMEM-resident)
    # b_ref: (2, 1)        Linear bias (VMEM-resident)
    # o_ref: (2, tm)       transposed probabilities (lanes = rows -> lane-dense stores)
    x = x_ref[...].astype(jnp.float32)
    w = w_ref[...].astype(jnp.float32)
    b = b_ref[...].astype(jnp.float32)

    # logits^T = W @ x^T : contract over n_mlp (MXU, f32 accumulation).
    logits = lax.dot_general(
        w, x,
        dimension_numbers=(((1,), (1,)), ((), ())),
        preferred_element_type=jnp.float32,
    ) + b                                      # bias broadcasts over lanes

    # LeakyReLU (PyTorch default negative_slope = 0.01)
    act = jnp.where(logits >= 0, logits, 0.01 * logits)

    # softmax over the 2 logits == sigmoid of the difference:
    #   p0 = 1 / (1 + exp(a1 - a0)),  p1 = 1 - p0
    d = act[0:1, :] - act[1:2, :]              # [1, tm]
    p0 = 1.0 / (1.0 + jnp.exp(-d))
    o_ref[0:1, :] = p0.astype(o_ref.dtype)
    o_ref[1:2, :] = (1.0 - p0).astype(o_ref.dtype)


def mlp_ag_forward(mlp_in, weight, bias, *, tm=8192):
    """mlp_in: [N, n_mlp]; weight: [2, n_mlp] (PyTorch Linear layout); bias: [2].

    Returns softmax(leaky_relu(mlp_in @ weight.T + bias), axis=1)  -> [N, 2].
    """
    N, n_mlp = mlp_in.shape
    assert weight.shape == (2, n_mlp)
    itemsize = jnp.dtype(mlp_in.dtype).itemsize

    # Row tile: as large as possible (kernel is HBM-bandwidth bound), but
    #   - a multiple of 128 (lane-dense output block),
    #   - VMEM-budgeted: double-buffered input + output tiles kept well under
    #     the scoped-VMEM limit (important on v7x where VMEM is 64 MiB total).
    vmem_tile_budget = 8 * 1024 * 1024
    max_tm_vmem = vmem_tile_budget // (2 * (n_mlp + 2) * itemsize)
    tm = min(tm, max_tm_vmem, _round_up(N, 128))
    tm = max(128, (tm // 128) * 128)

    grid_m = pl.cdiv(N, tm)

    b2 = bias.reshape(2, 1)

    # No host-side padding: Pallas masks partial blocks at the grid boundary
    # (OOB input rows are never reduced across, OOB output lanes are not written).
    out_t = pl.pallas_call(
        mlp_ag_kernel,
        out_shape=jax.ShapeDtypeStruct((2, N), mlp_in.dtype),
        grid_spec=pltpu.PrefetchScalarGridSpec(
            num_scalar_prefetch=0,
            grid=(grid_m,),
            in_specs=[
                pl.BlockSpec((tm, n_mlp), lambda i: (i, 0)),   # x row tile
                pl.BlockSpec((2, n_mlp), lambda i: (0, 0)),    # weight (resident)
                pl.BlockSpec((2, 1), lambda i: (0, 0)),        # bias (resident)
            ],
            out_specs=pl.BlockSpec((2, tm), lambda i: (0, i)),  # lane-dense block
        ),
        compiler_params=pltpu.CompilerParams(
            dimension_semantics=("parallel",),
            vmem_limit_bytes=32 * 1024 * 1024,
        ),
    )(mlp_in, weight, b2)

    # Tiny transpose back to row-major [N, 2] outside the kernel (2*N elements).
    return out_t.T


def reference_forward(mlp_in, weight, bias):
    logits = mlp_in @ weight.T + bias
    act = jnp.where(logits >= 0, logits, 0.01 * logits)
    return jax.nn.softmax(act, axis=1)


if __name__ == "__main__":
    key = jax.random.PRNGKey(0)
    k_x, k_w, k_b = jax.random.split(key, 3)

    # Small shapes consistent with the module (batch of samples, n_mlp features).
    N, n_mlp = 16, 32
    mlp_in = jax.random.normal(k_x, (N, n_mlp), dtype=jnp.float32)

    # Deterministic parameter init (mimics PyTorch Linear uniform bounds).
    bound = 1.0 / (n_mlp ** 0.5)
    weight = jax.random.uniform(k_w, (2, n_mlp), dtype=jnp.float32,
                                minval=-bound, maxval=bound)
    bias = jax.random.uniform(k_b, (2,), dtype=jnp.float32,
                              minval=-bound, maxval=bound)

    out = mlp_ag_forward(mlp_in, weight, bias)
    out = jax.block_until_ready(out)
    ref = reference_forward(mlp_in, weight, bias)
    assert out.shape == (N, 2)
    assert jnp.allclose(out, ref, atol=1e-5, rtol=1e-5), "mismatch vs reference (small)"

    # Second check: non-divisible N with multiple grid steps (partial last block).
    N2 = 9000
    x2 = jax.random.normal(k_x, (N2, n_mlp), dtype=jnp.float32)
    out2 = jax.block_until_ready(mlp_ag_forward(x2, weight, bias))
    ref2 = reference_forward(x2, weight, bias)
    assert out2.shape == (N2, 2)
    assert jnp.allclose(out2, ref2, atol=1e-5, rtol=1e-5), "mismatch vs reference (large)"

    print("KERNEL_OK")
</pallas_src>

<mosaic_0001>
module attributes {stable_mosaic.version = 11 : i64} {
  func.func @mlp_ag_kernel(%arg0: i32, %arg1: memref<128x32xf32, #tpu.memory_space<vmem>>, %arg2: memref<2x32xf32, #tpu.memory_space<vmem>>, %arg3: memref<2x1xf32, #tpu.memory_space<vmem>>, %arg4: memref<2x128xf32, #tpu.memory_space<vmem>>) attributes {dimension_semantics = [#tpu.dimension_semantics<parallel>], iteration_bounds = array<i64: 1>, scalar_prefetch = 0 : i64, scratch_operands = 0 : i64, tpu.core_type = #tpu.core_type<tc>, window_params = [{transform_indices = @transform_0, window_bounds = array<i64: 128, 32>}, {pipeline_mode = #tpu.pipeline_mode<synchronous>, transform_indices = @transform_1, window_bounds = array<i64: 2, 32>}, {pipeline_mode = #tpu.pipeline_mode<synchronous>, transform_indices = @transform_2, window_bounds = array<i64: 2, 1>}, {transform_indices = @transform_3, window_bounds = array<i64: 2, 128>}]} {
    %c0 = arith.constant 0 : index
    %c0_0 = arith.constant 0 : index
    %0 = vector.load %arg1[%c0, %c0_0] : memref<128x32xf32, #tpu.memory_space<vmem>>, vector<128x32xf32>
    %c0_1 = arith.constant 0 : index
    %c0_2 = arith.constant 0 : index
    %1 = vector.load %arg2[%c0_1, %c0_2] : memref<2x32xf32, #tpu.memory_space<vmem>>, vector<2x32xf32>
    %c0_3 = arith.constant 0 : index
    %c0_4 = arith.constant 0 : index
    %2 = vector.load %arg3[%c0_3, %c0_4] : memref<2x1xf32, #tpu.memory_space<vmem>>, vector<2x1xf32>
    %cst = arith.constant dense<0.000000e+00> : vector<2x128xf32>
    %3 = tpu.matmul %1, %0, %cst {dimension_numbers = #tpu.dot_dimension_numbers<[1], [1], [0], [0], [0, 0, 1, 0], [], []>} : vector<2x32xf32>, vector<128x32xf32>, vector<2x128xf32> -> vector<2x128xf32>
    %4 = vector.broadcast %2 : vector<2x1xf32> to vector<2x128xf32>
    %5 = arith.addf %3, %4 : vector<2x128xf32>
    %cst_5 = arith.constant 0.000000e+00 : f32
    %6 = vector.broadcast %cst_5 : f32 to vector<2x128xf32>
    %7 = arith.cmpf oge, %5, %6 : vector<2x128xf32>
    %cst_6 = arith.constant 0.00999999977 : f32
    %8 = vector.broadcast %cst_6 : f32 to vector<2x128xf32>
    %9 = arith.mulf %8, %5 : vector<2x128xf32>
    %10 = arith.select %7, %5, %9 : vector<2x128xi1>, vector<2x128xf32>
    %11 = vector.extract_strided_slice %10 {offsets = [0, 0], sizes = [1, 128], strides = [1, 1]} : vector<2x128xf32> to vector<1x128xf32>
    %12 = vector.extract_strided_slice %10 {offsets = [1, 0], sizes = [1, 128], strides = [1, 1]} : vector<2x128xf32> to vector<1x128xf32>
    %13 = arith.subf %11, %12 : vector<1x128xf32>
    %cst_7 = arith.constant 0.000000e+00 : f32
    %14 = vector.broadcast %cst_7 : f32 to vector<1x128xf32>
    %15 = arith.subf %14, %13 : vector<1x128xf32>
    %16 = math.exp %15 : vector<1x128xf32>
    %cst_8 = arith.constant 1.000000e+00 : f32
    %17 = vector.broadcast %cst_8 : f32 to vector<1x128xf32>
    %18 = arith.addf %17, %16 : vector<1x128xf32>
    %cst_9 = arith.constant 1.000000e+00 : f32
    %19 = vector.broadcast %cst_9 : f32 to vector<1x128xf32>
    %20 = arith.divf %19, %18 : vector<1x128xf32>
    %c0_10 = arith.constant 0 : index
    %c0_11 = arith.constant 0 : index
    %21 = vector.load %arg4[%c0_10, %c0_11] : memref<2x128xf32, #tpu.memory_space<vmem>>, vector<1x128xf32>
    tpu.vector_store %arg4[%c0_10, %c0_11], %20 {strides = array<i32>} : memref<2x128xf32, #tpu.memory_space<vmem>>, vector<1x128xf32>,
    %cst_12 = arith.constant 1.000000e+00 : f32
    %22 = vector.broadcast %cst_12 : f32 to vector<1x128xf32>
    %23 = arith.subf %22, %20 : vector<1x128xf32>
    %c1 = arith.constant 1 : index
    %c0_13 = arith.constant 0 : index
    %24 = vector.load %arg4[%c1, %c0_13] : memref<2x128xf32, #tpu.memory_space<vmem>>, vector<1x128xf32>
    tpu.vector_store %arg4[%c1, %c0_13], %23 {strides = array<i32>} : memref<2x128xf32, #tpu.memory_space<vmem>>, vector<1x128xf32>,
    return
  }
  func.func @transform_0(%arg0: i32) -> (i32, i32) {
    %c0_i32 = arith.constant 0 : i32
    %c0_i32_0 = arith.constant 0 : i32
    return %arg0, %c0_i32 : i32, i32
  }
  func.func @transform_1(%arg0: i32) -> (i32, i32) {
    %c0_i32 = arith.constant 0 : i32
    %c0_i32_0 = arith.constant 0 : i32
    %c0_i32_1 = arith.constant 0 : i32
    return %c0_i32, %c0_i32_0 : i32, i32
  }
  func.func @transform_2(%arg0: i32) -> (i32, i32) {
    %c0_i32 = arith.constant 0 : i32
    %c0_i32_0 = arith.constant 0 : i32
    %c0_i32_1 = arith.constant 0 : i32
    return %c0_i32, %c0_i32_0 : i32, i32
  }
  func.func @transform_3(%arg0: i32) -> (i32, i32) {
    %c0_i32 = arith.constant 0 : i32
    %c0_i32_0 = arith.constant 0 : i32
    return %c0_i32, %arg0 : i32, i32
  }
}

</mosaic_0001>

<bundles_post_ra>
// kernel: tpu_custom_call.1
= control target key start
LH: loop header
LB: loop body
LE: loop exit
PB: predicated region body
PF: predicated region fallthrough
CT: control target
= control target key end

     0   :  { %8 = vsyncpa [#allocation3], 0  ;;  %s448_s0 = inlined_call_operand.hbm [shape: f32[16,32], index: 0, kind: input, shape index: {}]   ;;  %s449_s1 = inlined_call_operand.vmem [shape: f32[2,32], index: 1, kind: input, shape index: {}]   ;;  %s450_s2 = inlined_call_operand.vmem [shape: f32[2,1], index: 2, kind: input, shape index: {}]   ;;  %s451_s3 = inlined_call_operand.hbm [shape: f32[2,16], index: 3, kind: output, shape index: {}]  }
   0x1   :  { %9 = vsyncpa [#allocation4], 0 }
   0x2   :  { %14 = vsyncadd [#allocation3], 1792  ;;  %s367_s12 = smov [#allocation2]   ;;  %s319_s16 = scalar_lea.hbm %s448_s0, 256 }
   0x3   :  { %s15_s13 = sshll.u32 %s367_s12, 4  ;;  %p320_p0 = scmp.ne.s32.totalorder %s448_s0, %s319_s16  ;;  %s16_s13 = int_to_ptr.vmem [resolvable:$true] %s15_s13 }
   0x4   :  { %p323_p1 = scmp.lt.u32.totalorder %s319_s16, %s448_s0 }
   0x6   :  { %p325_p2 = pnand %p323_p1, %p320_p0 }
   0x8   :  { %328 = shalt.err (!%p325_p2)
}
   0x9   :  { %s329_s21 = scalar_lea.vmem %s16_s13, 256  ;;  %s333_s22 = scalar_lea.vmem %s16_s13, 2048 }
   0xa   :  { %p330_p3 = scmp.ne.s32.totalorder %s16_s13, %s329_s21  ;;  %p334_p4 = scmp.lt.s32.totalorder %s16_s13, %s16_s13 }
   0xb   :  { %p335_p5 = scmp.lt.s32.totalorder %s333_s22, %s329_s21 }
   0xd   :  { %p336_p6 = por %p335_p5, %p334_p4 }
   0xf   :  { %p337_p7 = pnand %p336_p6, %p330_p3 }
  0x11   :  { %340 = shalt.err (!%p337_p7)
}
  0x12   :  { %s368_s23 = smov 128   ;;  %s369_s24 = smov 8  }
  0x13   :  { %21 = dma.hbm_to_vmem [thread:$0]  %s448_s0, 256, %s16_s13, [#allocation3], %s368_s23, %s368_s23, %s369_s24  }
  0x14   :  { %363 = dma.done.wait [#allocation3], 2048  }
  0x15   :  { %364 = vsyncadd [#allocation3], 4294965248  ;;  %v370_v0 = vmov 0.0|0.0   ;;  %vm371_vm0 = vmmov 0   ;;  %v372_v1 = vmov 0.0   ;;  %v373_v2 = vmov 0  }
  0x16   :  { %274 = vmatprep.subr.bf16.mxu0 %v370_v0  ;;  %271 = vmatprep.mubr.msk.f32.mxu0 %vm371_vm0, %v372_v1  ;;  %vm52_vm1 = vcmask 261120   ;;  %v29_v3 = vld [vmem:[#allocation2] sm:$0xff]  ;;  %v30_v4 = vld [vmem:[#allocation2 + $0x8] sm:$0xff]  ;;  %v31_v7 = vld [vmem:[#allocation2 + $0x10] sm:$0xff]  ;;  %s374_s29 = smov [#allocation5]  }
  0x17   :  { %314 = vset.pattern.permute.xlu0 %v373_v2  ;;  %vm409_vm2 = vmpackc.low %vm52_vm1, %vm52_vm1  ;;  %v275_v6 = vpack.c.bf16 %v30_v4, %v29_v3  ;;  %v32_v8 = vld [vmem:[#allocation2 + $0x18] sm:$0xff]  ;;  %v46_v9 = vld [vmem:[%s450_s2] sm:$0x3]  ;;  %s196_s30 = sshll.u32 %s374_s29, 4  ;;  %s197_s30 = int_to_ptr.vmem [resolvable:$true] %s196_s30 }
  0x18   :  { %49 = vperm.xlu0 %314, %v46_v9   ;;  %v279_v10 = vpack.c.bf16 %v32_v8, %v31_v7  ;;  %v33_v11 = vld [vmem:[#allocation2 + $0x20] sm:$0xff]  ;;  %v34_v12 = vld [vmem:[#allocation2 + $0x28] sm:$0xff]  ;;  %v35_v14 = vld [vmem:[#allocation2 + $0x30] sm:$0xff]  ;;  %p346_p9 = scmp.lt.s32.totalorder %s197_s30, %s197_s30 }
  0x19   :  { %277 = vmatpush3.bf16.xpose.msk.msra.mxu0 %vm409_vm2, %v275_v6  ;;  %v283_v13 = vpack.c.bf16 %v34_v12, %v33_v11  ;;  %v36_v15 = vld [vmem:[#allocation2 + $0x38] sm:$0xff]  ;;  %v37_v17 = vld [vmem:[#allocation2 + $0x40] sm:$0xff]  ;;  %v38_v18 = vld [vmem:[#allocation2 + $0x48] sm:$0xff] }
  0x1a   :  { %278 = vmatprep.subr.bf16.mxu0 %v370_v0  ;;  %v287_v16 = vpack.c.bf16 %v36_v15, %v35_v14  ;;  %v291_v19 = vpack.c.bf16 %v38_v18, %v37_v17  ;;  %v39_v20 = vld [vmem:[#allocation2 + $0x50] sm:$0xff]  ;;  %v40_v21 = vld [vmem:[#allocation2 + $0x58] sm:$0xff]  ;;  %v41_v23 = vld [vmem:[#allocation2 + $0x60] sm:$0xff] }
  0x1b   :  { %v295_v22 = vpack.c.bf16 %v40_v21, %v39_v20  ;;  %v42_v24 = vld [vmem:[#allocation2 + $0x68] sm:$0xff]  ;;  %v43_v26 = vld [vmem:[#allocation2 + $0x70] sm:$0xff]  ;;  %v44_v27 = vld [vmem:[#allocation2 + $0x78] sm:$0xff] }
  0x1c   :  { %v299_v25 = vpack.c.bf16 %v42_v24, %v41_v23  ;;  %v303_v28 = vpack.c.bf16 %v44_v27, %v43_v26  ;;  %v45_v29 = vld [vmem:[%s449_s1] sm:$0x3]  ;;  %s341_s1 = scalar_lea.vmem %s197_s30, 32 }
  0x1d   :  { %p342_p8 = scmp.ne.s32.totalorder %s197_s30, %s341_s1  ;;  %p347_p10 = scmp.lt.s32.totalorder %s341_s1, %s341_s1 }
  0x1f   :  { %p348_p11 = por %p347_p10, %p346_p9 }
  0x21   :  { %281 = vmatpush3.bf16.xpose.msk.msra.mxu0 %vm409_vm2, %v279_v10  ;;  %p349_p12 = pnand %p348_p11, %p342_p8 }
  0x22   :  { %282 = vmatprep.subr.bf16.mxu0 %v370_v0 }
  0x29   :  { %285 = vmatpush3.bf16.xpose.msk.msra.mxu0 %vm409_vm2, %v283_v13 }
  0x2a   :  { %286 = vmatprep.subr.bf16.mxu0 %v370_v0 }
  0x31   :  { %289 = vmatpush3.bf16.xpose.msk.msra.mxu0 %vm409_vm2, %v287_v16 }
  0x32   :  { %290 = vmatprep.subr.bf16.mxu0 %v370_v0 }
  0x39   :  { %293 = vmatpush3.bf16.xpose.msk.msra.mxu0 %vm409_vm2, %v291_v19 }
  0x3a   :  { %294 = vmatprep.subr.bf16.mxu0 %v370_v0 }
  0x41   :  { %297 = vmatpush3.bf16.xpose.msk.msra.mxu0 %vm409_vm2, %v295_v22 }
  0x42   :  { %298 = vmatprep.subr.bf16.mxu0 %v370_v0 }
  0x49   :  { %301 = vmatpush3.bf16.xpose.msk.msra.mxu0 %vm409_vm2, %v299_v25 }
  0x4a   :  { %302 = vmatprep.subr.bf16.mxu0 %v370_v0 }
  0x51   :  { %305 = vmatpush3.bf16.xpose.msk.msra.mxu0 %vm409_vm2, %v303_v28 }
  0x58   :  { %272 = vmatmul.mubr.msk.f32.vlgmr.msra.gmra.mrb[0].mxu0 %vm52_vm1, %v45_v29 }
  0x97   :  { %v50_v30 = vpop.permute.xlu0 %49 }
 0x12b   :  { %v170_v31 = vpop.f32.mrb[0].mxu0 }
 0x12c   :  { %v171_v32 = vadd.f32 %v170_v31, %v50_v30  ;;  %v273_v33 = vpop.f32.mrb[1].mxu0 }
 0x12e   :  { %vm174_vm3 = vcmp.ge.f32.partialorder %v171_v32, 0.0  ;;  %v175_v34 = vmul.f32 0.01, %v171_v32 }
 0x130   :  { %v176_v35 = vsel %vm174_vm3, %v171_v32, %v175_v34 }
 0x131   :  { %v178_v36 = vrot.slane %v176_v35, 1 }
 0x133   :  { %v180_v37 = vsub.f32 %v176_v35, %v178_v36 }
 0x135   :  { %v181_v38 = vsub.f32 0.0, %v180_v37 }
 0x137   :  { %v182_v39 = vmul.f32 1.442695, %v181_v38 }
 0x139   :  { %315 = vpow2.f32 %v182_v39 }
 0x143   :  { %v316_v40 = vpop.eup %315 }
 0x144   :  { %v184_v41 = vadd.f32 1.0, %v316_v40 }
 0x146   :  { %317 = vrcp.f32 %v184_v41 }
 0x150   :  { %v318_v42 = vpop.eup %317 }
 0x151   :  { %187 = vst [vmem:[#allocation5] sm:$0x1] %v318_v42  ;;  %v188_v43 = vsub.f32 1.0, %v318_v42 }
 0x153   :  { %189 = vst [vmem:[#allocation5 + $0x1] sm:$0x1] %v188_v43 }
 0x154   :  { %352 = shalt.err (!%p349_p12)
}
 0x155   :  { %s353_s6 = scalar_lea.hbm %s451_s3, 32 }
 0x156   :  { %p354_p13 = scmp.ne.s32.totalorder %s451_s3, %s353_s6  ;;  %p357_p0 = scmp.lt.u32.totalorder %s353_s6, %s451_s3 }
 0x158   :  { %p359_p1 = pnand %p357_p0, %p354_p13 }
 0x15a   :  { %362 = shalt.err (!%p359_p1)
}
 0x15b   :  { %199 = dma.vmem_to_hbm [thread:$0]  %s197_s30, 32, %s451_s3, [#allocation4]  }
 0x15c   :  { %365 = dma.done.wait [#allocation4], 32  }
 0x15d   :  { %366 = vsyncadd [#allocation4], 4294967264 }
 0x15e   :  { %203 = vsyncpa [#allocation3], 1 }
 0x15f   :  { %204 = vsyncpa [#allocation4], 1 }

</bundles_post_ra>
